<compile_context>
chip_gen: v7x
topology: tpu7x:2x2x1
jax: 0.10.0
libtpu: 0.0.40
codegen_flags: <defaults>
</compile_context>

<pallas_src>
import functools

import jax
import jax.numpy as jnp
from jax.experimental import pallas as pl
from jax.experimental.pallas import tpu as pltpu


# --------------------------------------------------------------------------
# Kernels
# --------------------------------------------------------------------------
def _loss_kernel(o1_ref, o2_ref, y_ref, partial_ref, *, margin):
    # o1_ref / o2_ref : (TN, D) native dtype (bf16/f32), cast on load
    # y_ref           : (TN, 1) f32, 1.0 where labels match (padding rows = 1.0)
    # partial_ref     : (1, 1)  f32 per-tile partial sum of per-pair losses
    diff = o1_ref[...].astype(jnp.float32) - o2_ref[...].astype(jnp.float32)  # VPU
    dist_sq = jnp.sum(diff * diff, axis=1, keepdims=True)                     # (TN,1) XLU
    dist = jnp.sqrt(dist_sq)                                                  # EUP
    mdist = jnp.maximum(margin - dist, 0.0)                                   # clamp(min=0)
    y = y_ref[...]
    per_pair = y * dist_sq + (1.0 - y) * (mdist * mdist)
    partial_ref[...] = jnp.sum(per_pair, keepdims=True)                       # (1,1)


def _distsq_kernel(o1_ref, o2_ref, dsq_ref):
    # flag=1 path: only dist_sq is needed from the kernel (y comes from wrapper).
    diff = o1_ref[...].astype(jnp.float32) - o2_ref[...].astype(jnp.float32)
    dsq_ref[...] = jnp.sum(diff * diff, axis=1, keepdims=True)


# --------------------------------------------------------------------------
# Tiling helper: largest row-tile that keeps double-buffered inputs + f32
# temporaries within a conservative ~24 MiB budget (fits v7x's 64 MiB VMEM
# with headroom; also fine on v5e/v6e).
# --------------------------------------------------------------------------
def _choose_tiling(n, d, itemsize, budget_bytes=24 * 1024 * 1024, cap=1024):
    # per row: 2 inputs x 2 buffers of native dtype + ~2 f32 temporaries
    per_row = d * (4 * itemsize + 8) + 64
    tn = budget_bytes // max(per_row, 1)
    tn = max(8, min(cap, (tn // 8) * 8))
    n8 = ((n + 7) // 8) * 8
    if tn >= n8:
        return n8, n8                      # single tile covers all rows
    n_pad = pl.cdiv(n, tn) * tn
    return tn, n_pad


_COMPILER_PARAMS = pltpu.CompilerParams(
    dimension_semantics=("parallel",),
    vmem_limit_bytes=32 * 1024 * 1024,
)


# --------------------------------------------------------------------------
# Public wrapper (mirrors ContrastiveLoss.forward, mode='normal')
# --------------------------------------------------------------------------
def contrastive_loss(out1, out2, lbl1, lbl2, *, margin=1.0, flag=0,
                     mode="normal"):
    if mode != "normal":
        # TODO(synk): cosine mode needs host-side data-dependent indexing/randint.
        raise NotImplementedError("Only mode='normal' is implemented in Pallas.")

    n, d = out1.shape
    itemsize = jnp.dtype(out1.dtype).itemsize
    tn, n_pad = _choose_tiling(n, d, itemsize)
    num_tiles = n_pad // tn
    pad = n_pad - n

    # Label equality in the labels' native dtype (matches torch `lbl1 == lbl2`).
    y_int = (lbl1 == lbl2).astype(jnp.int32)                 # returned for flag=1
    y_f32 = y_int.astype(jnp.float32).reshape(n, 1)

    # Pad rows: zero embeddings + y=1.0 -> padded rows contribute exactly 0.
    if pad:
        out1 = jnp.pad(out1, ((0, pad), (0, 0)))
        out2 = jnp.pad(out2, ((0, pad), (0, 0)))
        y_f32 = jnp.pad(y_f32, ((0, pad), (0, 0)), constant_values=1.0)

    emb_spec = pl.BlockSpec((tn, d), lambda i: (i, 0))

    if flag:
        dsq = pl.pallas_call(
            _distsq_kernel,
            grid=(num_tiles,),
            in_specs=[emb_spec, emb_spec],
            out_specs=pl.BlockSpec((tn, 1), lambda i: (i, 0)),
            out_shape=jax.ShapeDtypeStruct((n_pad, 1), jnp.float32),
            compiler_params=_COMPILER_PARAMS,
        )(out1, out2)
        return dsq[:n, 0], y_int

    partials = pl.pallas_call(
        functools.partial(_loss_kernel, margin=float(margin)),
        grid=(num_tiles,),
        in_specs=[emb_spec, emb_spec, pl.BlockSpec((tn, 1), lambda i: (i, 0))],
        out_specs=pl.BlockSpec((1, 1), lambda i: (i, 0)),
        out_shape=jax.ShapeDtypeStruct((num_tiles, 1), jnp.float32),
        compiler_params=_COMPILER_PARAMS,
    )(out1, out2, y_f32)

    # Tiny final reduction over per-tile partials (keeps the grid "parallel").
    return jnp.sum(partials) * (0.5 / n)


# --------------------------------------------------------------------------
# Pure-JAX reference (correctness check only).
# --------------------------------------------------------------------------
def reference_contrastive(out1, out2, lbl1, lbl2, margin=1.0):
    diff = out1 - out2
    dist_sq = jnp.sum(diff * diff, axis=1)
    dist = jnp.sqrt(dist_sq)
    mdist = jnp.maximum(margin - dist, 0.0)
    y = (lbl1 == lbl2).astype(jnp.float32)
    loss = y * dist_sq + (1.0 - y) * mdist * mdist
    return jnp.sum(loss) / 2.0 / out1.shape[0]


if __name__ == "__main__":
    key = jax.random.PRNGKey(0)
    k1, k2, k3, k4 = jax.random.split(key, 4)

    N, D = 10, 128                      # non-multiple-of-8 batch exercises padding
    out1 = jax.random.normal(k1, (N, D), jnp.float32)
    out2 = jax.random.normal(k2, (N, D), jnp.float32)
    lbl1 = jax.random.randint(k3, (N,), 0, 3)
    lbl2 = jax.random.randint(k4, (N,), 0, 3)

    # flag=0 path: scalar loss (f32 inputs)
    loss = contrastive_loss(out1, out2, lbl1, lbl2, margin=1.0)
    loss = jax.block_until_ready(loss)
    ref = reference_contrastive(out1, out2, lbl1, lbl2, margin=1.0)
    assert jnp.allclose(loss, ref, atol=1e-5, rtol=1e-5), (loss, ref)

    # flag=1 path: (dist_sq, y)
    dsq, y = contrastive_loss(out1, out2, lbl1, lbl2, margin=1.0, flag=1)
    dsq, y = jax.block_until_ready((dsq, y))
    ref_dsq = jnp.sum((out1 - out2) ** 2, axis=1)
    ref_y = (lbl1 == lbl2).astype(jnp.int32)
    assert jnp.allclose(dsq, ref_dsq, atol=1e-4, rtol=1e-4)
    assert jnp.array_equal(y, ref_y)

    # bf16 embeddings fed straight into the kernel (cast happens on-chip).
    loss_bf16 = contrastive_loss(out1.astype(jnp.bfloat16),
                                 out2.astype(jnp.bfloat16),
                                 lbl1, lbl2, margin=1.0)
    loss_bf16 = jax.block_until_ready(loss_bf16)
    assert jnp.allclose(loss_bf16, ref, atol=0.05, rtol=0.05), (loss_bf16, ref)

    print("KERNEL_OK")
</pallas_src>

<mosaic_0001>
module attributes {stable_mosaic.version = 11 : i64} {
  func.func @_loss_kernel(%arg0: i32, %arg1: memref<16x128xf32, #tpu.memory_space<vmem>>, %arg2: memref<16x128xf32, #tpu.memory_space<vmem>>, %arg3: memref<16x1xf32, #tpu.memory_space<vmem>>, %arg4: memref<1x1xf32, #tpu.memory_space<vmem>>) attributes {dimension_semantics = [#tpu.dimension_semantics<parallel>], iteration_bounds = array<i64: 1>, scalar_prefetch = 0 : i64, scratch_operands = 0 : i64, tpu.core_type = #tpu.core_type<tc>, window_params = [{transform_indices = @transform_0, window_bounds = array<i64: 16, 128>}, {transform_indices = @transform_1, window_bounds = array<i64: 16, 128>}, {transform_indices = @transform_2, window_bounds = array<i64: 16, 1>}, {transform_indices = @transform_3, window_bounds = array<i64: 1, 1>}]} {
    %c0 = arith.constant 0 : index
    %c0_0 = arith.constant 0 : index
    %0 = vector.load %arg1[%c0, %c0_0] : memref<16x128xf32, #tpu.memory_space<vmem>>, vector<16x128xf32>
    %c0_1 = arith.constant 0 : index
    %c0_2 = arith.constant 0 : index
    %1 = vector.load %arg2[%c0_1, %c0_2] : memref<16x128xf32, #tpu.memory_space<vmem>>, vector<16x128xf32>
    %2 = arith.subf %0, %1 : vector<16x128xf32>
    %3 = arith.mulf %2, %2 : vector<16x128xf32>
    %cst = arith.constant dense<0.000000e+00> : vector<16xf32>
    %4 = vector.multi_reduction <add>, %3, %cst [1] : vector<16x128xf32> to vector<16xf32>
    %5 = vector.shape_cast %4 : vector<16xf32> to vector<16x1xf32>
    %6 = math.sqrt %5 : vector<16x1xf32>
    %cst_3 = arith.constant 1.000000e+00 : f32
    %7 = vector.broadcast %cst_3 : f32 to vector<16x1xf32>
    %8 = arith.subf %7, %6 : vector<16x1xf32>
    %cst_4 = arith.constant 0.000000e+00 : f32
    %9 = vector.broadcast %cst_4 : f32 to vector<16x1xf32>
    %10 = arith.maximumf %8, %9 : vector<16x1xf32>
    %c0_5 = arith.constant 0 : index
    %c0_6 = arith.constant 0 : index
    %11 = vector.load %arg3[%c0_5, %c0_6] : memref<16x1xf32, #tpu.memory_space<vmem>>, vector<16x1xf32>
    %12 = arith.mulf %11, %5 : vector<16x1xf32>
    %cst_7 = arith.constant 1.000000e+00 : f32
    %13 = vector.broadcast %cst_7 : f32 to vector<16x1xf32>
    %14 = arith.subf %13, %11 : vector<16x1xf32>
    %15 = arith.mulf %10, %10 : vector<16x1xf32>
    %16 = arith.mulf %14, %15 : vector<16x1xf32>
    %17 = arith.addf %12, %16 : vector<16x1xf32>
    %18 = vector.shape_cast %17 : vector<16x1xf32> to vector<1x16x1xf32>
    %cst_8 = arith.constant dense<0.000000e+00> : vector<1xf32>
    %19 = vector.multi_reduction <add>, %18, %cst_8 [1, 2] : vector<1x16x1xf32> to vector<1xf32>
    %20 = vector.shape_cast %19 : vector<1xf32> to vector<1x1x1xf32>
    %21 = vector.extract %20[0, 0, 0] : f32 from vector<1x1x1xf32>
    %22 = vector.broadcast %21 : f32 to vector<1x1xf32>
    %c0_9 = arith.constant 0 : index
    %c0_10 = arith.constant 0 : index
    %23 = vector.load %arg4[%c0_9, %c0_10] : memref<1x1xf32, #tpu.memory_space<vmem>>, vector<1x1xf32>
    tpu.vector_store %arg4[%c0_9, %c0_10], %22 {strides = array<i32>} : memref<1x1xf32, #tpu.memory_space<vmem>>, vector<1x1xf32>,
    return
  }
  func.func @transform_0(%arg0: i32) -> (i32, i32) {
    %c0_i32 = arith.constant 0 : i32
    %c0_i32_0 = arith.constant 0 : i32
    return %arg0, %c0_i32 : i32, i32
  }
  func.func @transform_1(%arg0: i32) -> (i32, i32) {
    %c0_i32 = arith.constant 0 : i32
    %c0_i32_0 = arith.constant 0 : i32
    return %arg0, %c0_i32 : i32, i32
  }
  func.func @transform_2(%arg0: i32) -> (i32, i32) {
    %c0_i32 = arith.constant 0 : i32
    %c0_i32_0 = arith.constant 0 : i32
    return %arg0, %c0_i32 : i32, i32
  }
  func.func @transform_3(%arg0: i32) -> (i32, i32) {
    %c0_i32 = arith.constant 0 : i32
    %c0_i32_0 = arith.constant 0 : i32
    return %arg0, %c0_i32 : i32, i32
  }
}

</mosaic_0001>

<bundles_post_ra>
// kernel: tpu_custom_call.1
= control target key start
LH: loop header
LB: loop body
LE: loop exit
PB: predicated region body
PF: predicated region fallthrough
CT: control target
= control target key end

     0   :  { %8 = vsyncpa [#allocation3], 0  ;;  %s220_s0 = inlined_call_operand.vmem [shape: f32[16,128], index: 0, kind: input, shape index: {}]   ;;  %s221_s1 = inlined_call_operand.hbm [shape: f32[16,128], index: 1, kind: input, shape index: {}]   ;;  %s222_s2 = inlined_call_operand.vmem [shape: f32[16,1], index: 2, kind: input, shape index: {}]   ;;  %s223_s3 = inlined_call_operand.hbm [shape: f32[1,1], index: 3, kind: output, shape index: {}]  }
   0x1   :  { %9 = vsyncpa [#allocation4], 0  ;;  %s160_s12 = smov [#allocation2]   ;;  %s112_s16 = scalar_lea.hbm %s221_s1, 256 }
   0x2   :  { %s17_s13 = sshll.u32 %s160_s12, 4  ;;  %p113_p0 = scmp.ne.s32.totalorder %s221_s1, %s112_s16  ;;  %s18_s13 = int_to_ptr.vmem [resolvable:$true] %s17_s13 }
   0x3   :  { %p116_p1 = scmp.lt.u32.totalorder %s112_s16, %s221_s1 }
   0x5   :  { %p118_p2 = pnand %p116_p1, %p113_p0 }
   0x7   :  { %121 = shalt.err (!%p118_p2)
}
   0x8   :  { %s122_s21 = scalar_lea.vmem %s18_s13, 256  ;;  %p127_p4 = scmp.lt.s32.totalorder %s18_s13, %s18_s13 }
   0x9   :  { %p123_p3 = scmp.ne.s32.totalorder %s18_s13, %s122_s21  ;;  %p128_p5 = scmp.lt.s32.totalorder %s122_s21, %s122_s21 }
   0xb   :  { %p129_p6 = por %p128_p5, %p127_p4 }
   0xd   :  { %p130_p7 = pnand %p129_p6, %p123_p3 }
   0xf   :  { %133 = shalt.err (!%p130_p7)
}
  0x10   :  { %s161_s22 = smov 128   ;;  %s162_s23 = smov 8  }
  0x11   :  { %23 = dma.hbm_to_vmem [thread:$0]  %s221_s1, 256, %s18_s13, [#allocation3], %s161_s22, %s161_s22, %s162_s23  }
  0x12   :  { %156 = dma.done.wait [#allocation3], 256  }
  0x13   :  { %157 = vsyncadd [#allocation3], 4294967040  ;;  %v29_v0 = vld [vmem:[%s220_s0] sm:$0xff]  ;;  %v30_v2 = vld [vmem:[%s220_s0 + $0x8] sm:$0xff]  ;;  %vm71_vm4 = vcmask 7168   ;;  %vm85_vm5 = vcmask 0  }
  0x14   :  { %v31_v1 = vld [vmem:[#allocation2] sm:$0xff]  ;;  %v32_v4 = vld [vmem:[#allocation2 + $0x8] sm:$0xff] }
  0x15   :  { %v33_v3 = vsub.f32 %v29_v0, %v31_v1  ;;  %v34_v5 = vsub.f32 %v30_v2, %v32_v4  ;;  %v59_v19 = vld [vmem:[%s222_s2] sm:$0xff]  ;;  %v60_v26 = vld [vmem:[%s222_s2 + $0x8] sm:$0xff]  ;;  %s163_s2 = smov [#allocation5]  }
  0x16   :  { %v63_v22 = vsub.f32 1.0, %v59_v19  ;;  %v64_v28 = vsub.f32 1.0, %v60_v26  ;;  %s93_s5 = sshll.u32 %s163_s2, 4  ;;  %s94_s5 = int_to_ptr.vmem [resolvable:$true] %s93_s5 }
  0x17   :  { %v35_v6 = vmul.f32 %v33_v3, %v33_v3  ;;  %v36_v7 = vmul.f32 %v34_v5, %v34_v5  ;;  %s134_s7 = scalar_lea.vmem %s94_s5, 16  ;;  %s138_s8 = scalar_lea.vmem %s94_s5, 32 }
  0x18   :  { %p135_p8 = scmp.ne.s32.totalorder %s94_s5, %s134_s7  ;;  %p139_p9 = scmp.lt.s32.totalorder %s94_s5, %s94_s5 }
  0x19   :  { %37 = vadd.xlane.f32.xlu0 %v35_v6  ;;  %p140_p10 = scmp.lt.s32.totalorder %s138_s8, %s134_s7 }
  0x1b   :  { %p141_p11 = por %p140_p10, %p139_p9 }
  0x1d   :  { %39 = vadd.xlane.f32.xlu0 %v36_v7  ;;  %p142_p12 = pnand %p141_p11, %p135_p8 }
  0xa6   :  { %v38_v8 = vpop.xlane.xlu0 %37 }
  0xa7   :  { %108 = vrsqrt.f32 %v38_v8  ;;  %vm43_vm0 = vcmp.eq.f32.partialorder %v38_v8, inf  ;;  %v46_v12 = vand.u32 2147483648, %v38_v8  ;;  %vm45_vm1 = vcmp.eq.f32.partialorder %v38_v8, 0.0 }
  0xa8   :  { %v61_v30 = vmul.f32 %v59_v19, %v38_v8 }
  0xaa   :  { %v40_v9 = vpop.xlane.xlu0 %39 }
  0xab   :  { %110 = vrsqrt.f32 %v40_v9  ;;  %vm50_vm2 = vcmp.eq.f32.partialorder %v40_v9, inf  ;;  %v53_v18 = vand.u32 2147483648, %v40_v9  ;;  %vm52_vm3 = vcmp.eq.f32.partialorder %v40_v9, 0.0 }
  0xac   :  { %v62_v32 = vmul.f32 %v60_v26, %v40_v9 }
  0xb1   :  { %v109_v10 = vpop.eup %108 }
  0xb2   :  { %v42_v11 = vmul.f32 %v109_v10, %v38_v8 }
  0xb4   :  { %v44_v13 = vsel %vm43_vm0, %v38_v8, %v42_v11 }
  0xb5   :  { %v111_v14 = vpop.eup %110  ;;  %v47_v15 = vsel %vm45_vm1, %v46_v12, %v44_v13 }
  0xb6   :  { %v49_v16 = vmul.f32 %v111_v14, %v40_v9  ;;  %v55_v17 = vsub.f32 1.0, %v47_v15 }
  0xb8   :  { %v51_v20 = vsel %vm50_vm2, %v40_v9, %v49_v16  ;;  %v57_v21 = vmax.f32 %v55_v17, 0.0 }
  0xb9   :  { %v54_v23 = vsel %vm52_vm3, %v53_v18, %v51_v20 }
  0xba   :  { %v56_v24 = vsub.f32 1.0, %v54_v23  ;;  %v65_v25 = vmul.f32 %v57_v21, %v57_v21 }
  0xbc   :  { %v58_v27 = vmax.f32 %v56_v24, 0.0  ;;  %v67_v29 = vmul.f32 %v65_v25, %v63_v22 }
  0xbe   :  { %v66_v31 = vmul.f32 %v58_v27, %v58_v27  ;;  %v69_v34 = vadd.f32 %v67_v29, %v61_v30 }
  0xc0   :  { %v68_v33 = vmul.f32 %v66_v31, %v64_v28  ;;  %v72_v36 = vsel %vm71_vm4, %v69_v34, 0.0 }
  0xc2   :  { %v70_v35 = vadd.f32 %v68_v33, %v62_v32 }
  0xc4   :  { %v73_v37 = vsel %vm71_vm4, %v70_v35, 0.0 }
  0xc5   :  { %v74_v38 = vadd.f32 %v73_v37, %v72_v36 }
  0xc7   :  { %75 = vadd.xlane.f32.xlu1 %v74_v38 }
 0x154   :  { %v76_v39 = vpop.xlane.xlu1 %75 }
 0x155   :  { %v77_v40 = vrot.slane %v76_v39, 4 }
 0x157   :  { %v78_v41 = vadd.f32 %v77_v40, %v76_v39 }
 0x159   :  { %v79_v42 = vrot.slane %v78_v41, 2 }
 0x15b   :  { %v80_v43 = vadd.f32 %v79_v42, %v78_v41 }
 0x15d   :  { %v81_v44 = vrot.slane %v80_v43, 1 }
 0x15f   :  { %v82_v45 = vadd.f32 %v81_v44, %v80_v43 }
 0x161   :  { %102 = vpush %v82_v45 }
 0x192   :  { %s103_s6 = spop %102 }
 0x193   :  { %v84_v46 = vstv %s103_s6 }
 0x194   :  { %86 = vst.msk [vmem:[#allocation5] sm:$0x1] %vm85_vm5, %v84_v46 }
 0x195   :  { %145 = shalt.err (!%p142_p12)
}
 0x196   :  { %s146_s11 = scalar_lea.hbm %s223_s3, 16 }
 0x197   :  { %p147_p13 = scmp.ne.s32.totalorder %s223_s3, %s146_s11  ;;  %p150_p0 = scmp.lt.u32.totalorder %s146_s11, %s223_s3 }
 0x199   :  { %p152_p1 = pnand %p150_p0, %p147_p13 }
 0x19b   :  { %155 = shalt.err (!%p152_p1)
}
 0x19c   :  { %96 = dma.vmem_to_hbm [thread:$0]  %s94_s5, 16, %s223_s3, [#allocation4]  }
 0x19d   :  { %158 = dma.done.wait [#allocation4], 16  }
 0x19e   :  { %159 = vsyncadd [#allocation4], 4294967280 }
 0x19f   :  { %100 = vsyncpa [#allocation3], 1 }
 0x1a0   :  { %101 = vsyncpa [#allocation4], 1 }

</bundles_post_ra>
